<compile_context>
chip_gen: v7x
topology: tpu7x:2x2x1
jax: 0.10.0
libtpu: 0.0.40
codegen_flags: <defaults>
</compile_context>

<pallas_src>
import functools

import numpy as np

import jax
import jax.numpy as jnp
from jax.experimental import pallas as pl
from jax.experimental.pallas import tpu as pltpu


# Longest T for which the banded (T, T) averaging matrix path is used
# (A is f32: T=1024 -> 4 MiB, 8 MiB double-buffered -- fits even v7x VMEM).
_T_MATMUL_MAX = 1024
# Cap on how many batch rows a single block unrolls over inside the kernel.
_TILE_B_MAX = 32


# ---------------------------------------------------------------------------
# Path 1 (main): moving average as a banded matmul on the MXU.
# ---------------------------------------------------------------------------
def _decomp_matmul_kernel(a_ref, x_ref, res_ref, mean_ref):
    # a_ref: (T, T) averaging matrix; x/res/mean refs: (tile_b, T, tile_c).
    tile_b = x_ref.shape[0]
    a = a_ref[...]
    for b in range(tile_b):                     # static unroll (tile_b <= 32)
        xb = x_ref[b]                           # (T, tile_c), caller's dtype
        mean = jnp.dot(a, xb.astype(a.dtype),
                       preferred_element_type=jnp.float32)
        mean_ref[b] = mean.astype(mean_ref.dtype)
        # Re-read x from VMEM for the residual instead of keeping a long-lived
        # f32 copy across the matmul.
        res_ref[b] = (x_ref[b].astype(jnp.float32) - mean).astype(res_ref.dtype)


def _build_avg_matrix(T, kernel_size, dtype):
    """(T, T) matrix M such that mean = M @ x; edge replication folded in."""
    pad = (kernel_size - 1) // 2
    a = np.zeros((T, T), np.float32)
    rows = np.arange(T)
    for j in range(-pad, pad + 1):
        cols = np.clip(rows + j, 0, T - 1)
        np.add.at(a, (rows, cols), 1.0)
    a /= float(kernel_size)
    return jnp.asarray(a, dtype=dtype)


# ---------------------------------------------------------------------------
# Path 2 (long sequences, T > _T_MATMUL_MAX): O(log2 k) windowed sum using
# pltpu.roll (XLU), with the first/last `pad` rows recomputed exactly.
# The bulk result near the edges picks up wrapped values from the rolls; those
# rows are overwritten below, so the bulk math is correct regardless of the
# rotation convention (the centered window is symmetric).
# ---------------------------------------------------------------------------
def _decomp_roll_kernel(x_ref, res_ref, mean_ref, *, kernel_size: int):
    tile_b, T, _ = x_ref.shape
    pad = (kernel_size - 1) // 2
    inv_k = 1.0 / kernel_size

    for b in range(tile_b):                     # static unroll (tile_b <= 32)
        x = x_ref[b].astype(jnp.float32)        # (T, tile_c)

        # --- bulk: windowed sum via shift-doubling (rolls on the XLU) ------
        sums = {1: x}
        p = 1
        while 2 * p <= kernel_size:
            sp = sums[p]
            sums[2 * p] = sp + pltpu.roll(sp, shift=(T - p) % T, axis=0)
            p *= 2
        acc = None
        offset = 0
        rem = kernel_size
        while p >= 1:
            if rem >= p:
                sp = sums[p]
                if acc is None:
                    acc = sp
                else:
                    acc = acc + pltpu.roll(sp, shift=(T - offset) % T, axis=0)
                offset += p
                rem -= p
            p //= 2
        if pad > 0:
            acc = pltpu.roll(acc, shift=pad % T, axis=0)   # center the window
        mean = acc * inv_k
        mean_ref[b] = mean.astype(mean_ref.dtype)
        res_ref[b] = (x - mean).astype(res_ref.dtype)

        # --- exact first/last `pad` rows (tiny per-row sums, overwrite) ----
        if pad > 0:
            first = x[0:1, :]
            last = x[T - 1:T, :]
            # front rows t = 0..pad-1:
            #   mean[t] = ((pad - t) * x[0] + sum_{s=0..t+pad} x[s]) / k
            csum = jnp.zeros_like(first)
            for s in range(pad):
                csum = csum + x[s:s + 1, :]
            for t in range(pad):
                csum = csum + x[t + pad:t + pad + 1, :]
                m_row = ((pad - t) * first + csum) * inv_k
                mean_ref[b, t:t + 1, :] = m_row.astype(mean_ref.dtype)
                res_ref[b, t:t + 1, :] = (x[t:t + 1, :] - m_row).astype(res_ref.dtype)
            # back rows t = T-1 .. T-pad:
            #   mean[t] = ((t+pad-(T-1)) * x[T-1] + sum_{s=t-pad..T-1} x[s]) / k
            csum = jnp.zeros_like(last)
            for s in range(T - pad, T):
                csum = csum + x[s:s + 1, :]
            for i in range(pad):
                t = T - 1 - i
                csum = csum + x[t - pad:t - pad + 1, :]
                m_row = ((t + pad - (T - 1)) * last + csum) * inv_k
                mean_ref[b, t:t + 1, :] = m_row.astype(mean_ref.dtype)
                res_ref[b, t:t + 1, :] = (x[t:t + 1, :] - m_row).astype(res_ref.dtype)


# ---------------------------------------------------------------------------
# Tiling / VMEM heuristics (generation aware).
# ---------------------------------------------------------------------------
def _pick_tiles(B, T, C, itemsize):
    try:
        vmem_cap = int(pltpu.get_tpu_info().vmem_capacity_bytes)
    except Exception:
        vmem_cap = 64 * 1024 * 1024             # be conservative if unknown
    small_vmem = vmem_cap <= 64 * 1024 * 1024   # v7x-class (64 MiB per TC)
    # Input-block byte target: ~2 MiB keeps (in + 2 outs, double-buffered,
    # plus f32 temporaries) well inside 64 MiB; 128-MiB parts (v5e/v6e) take
    # larger blocks to amortize the ~0.35 us per-grid-step overhead.
    target = (2 if small_vmem else 6) * 1024 * 1024
    vmem_limit = (48 if small_vmem else 96) * 1024 * 1024

    row_bytes = T * itemsize
    if C >= 128:
        max_c = max(128, ((target // row_bytes) // 128) * 128)  # lane-dense
        tile_c = C if max_c >= C else int(max_c)
    else:
        # Small C (TimeMixer variate counts like 7/8/21): keep full C.
        # TODO(synk): outputs use masked (non-lane-dense) stores for C < 128;
        # padding C to 128 or transposing to [B, C, T] in the wrapper would
        # make stores lane-dense but costs extra full HBM passes, which
        # dominates for this bandwidth-bound op.
        tile_c = C
    tile_b = int(max(1, min(B, _TILE_B_MAX,
                            target // max(1, T * tile_c * itemsize))))
    # Keep >= 2 grid steps when possible (v7x two-TC sharding + pipelining).
    if B > 1 and pl.cdiv(B, tile_b) * pl.cdiv(C, tile_c) < 2:
        tile_b = pl.cdiv(B, 2)
    return tile_b, tile_c, vmem_limit


def series_decomp(x, kernel_size, *, force_path=None):
    """Pallas TPU series_decomp: returns (res, moving_mean), both [B, T, C]."""
    if kernel_size < 1:
        raise ValueError("kernel_size must be >= 1")
    if kernel_size % 2 == 0:
        # The PyTorch module only produces a shape-matching output for odd k.
        raise ValueError("series_decomp requires an odd kernel_size")

    B, T, C = x.shape
    tile_b, tile_c, vmem_limit = _pick_tiles(B, T, C, x.dtype.itemsize)
    grid = (pl.cdiv(B, tile_b), pl.cdiv(C, tile_c))

    if force_path is None:
        use_matmul = (T <= _T_MATMUL_MAX) or (T < kernel_size)
    else:
        use_matmul = force_path == "matmul"

    x_spec = pl.BlockSpec((tile_b, T, tile_c), lambda bi, ci: (bi, 0, ci))
    out_shape = (jax.ShapeDtypeStruct((B, T, C), x.dtype),
                 jax.ShapeDtypeStruct((B, T, C), x.dtype))
    compiler_params = pltpu.CompilerParams(
        dimension_semantics=("parallel", "parallel"),
        vmem_limit_bytes=vmem_limit,
    )

    if use_matmul:
        a_dtype = jnp.bfloat16 if x.dtype == jnp.bfloat16 else jnp.float32
        a = _build_avg_matrix(T, kernel_size, a_dtype)
        grid_spec = pltpu.PrefetchScalarGridSpec(
            num_scalar_prefetch=0,
            grid=grid,
            in_specs=[pl.BlockSpec((T, T), lambda bi, ci: (0, 0)), x_spec],
            out_specs=[x_spec, x_spec],
        )
        res, mean = pl.pallas_call(
            _decomp_matmul_kernel,
            out_shape=out_shape,
            grid_spec=grid_spec,
            compiler_params=compiler_params,
        )(a, x)
    else:
        kernel = functools.partial(_decomp_roll_kernel, kernel_size=kernel_size)
        grid_spec = pltpu.PrefetchScalarGridSpec(
            num_scalar_prefetch=0,
            grid=grid,
            in_specs=[x_spec],
            out_specs=[x_spec, x_spec],
        )
        res, mean = pl.pallas_call(
            kernel,
            out_shape=out_shape,
            grid_spec=grid_spec,
            compiler_params=compiler_params,
        )(x)
    return res, mean


def _reference(x, kernel_size):
    pad = (kernel_size - 1) // 2
    front = jnp.repeat(x[:, 0:1, :], pad, axis=1)
    end = jnp.repeat(x[:, -1:, :], pad, axis=1)
    xpad = jnp.concatenate([front, x, end], axis=1)
    T = x.shape[1]
    windows = jnp.stack([xpad[:, t:t + T, :] for t in range(kernel_size)], axis=0)
    mean = jnp.mean(windows, axis=0)
    return x - mean, mean


if __name__ == "__main__":
    key = jax.random.PRNGKey(0)
    B, T, C = 2, 16, 8
    kernel_size = 5  # odd, as used by series_decomp in practice
    x = jax.random.normal(key, (B, T, C), dtype=jnp.float32)

    res_ref, mean_ref = _reference(x, kernel_size)

    # Main (MXU banded-matmul) path — covers all realistic TimeMixer lengths.
    res, mean = series_decomp(x, kernel_size)
    jax.block_until_ready((res, mean))
    assert res.shape == x.shape and mean.shape == x.shape
    assert jnp.allclose(mean, mean_ref, atol=1e-5, rtol=1e-5)
    assert jnp.allclose(res, res_ref, atol=1e-5, rtol=1e-5)

    # Long-sequence fallback (roll-based), forced on the same small input so
    # both code paths are validated.
    res2, mean2 = series_decomp(x, kernel_size, force_path="roll")
    jax.block_until_ready((res2, mean2))
    assert jnp.allclose(mean2, mean_ref, atol=1e-5, rtol=1e-5)
    assert jnp.allclose(res2, res_ref, atol=1e-5, rtol=1e-5)

    print("KERNEL_OK")
</pallas_src>

<mosaic_0001>
module attributes {stable_mosaic.version = 11 : i64} {
  func.func @_decomp_matmul_kernel(%arg0: i32, %arg1: i32, %arg2: memref<16x16xf32, #tpu.memory_space<vmem>>, %arg3: memref<1x16x8xf32, #tpu.memory_space<vmem>>, %arg4: memref<1x16x8xf32, #tpu.memory_space<vmem>>, %arg5: memref<1x16x8xf32, #tpu.memory_space<vmem>>) attributes {dimension_semantics = [#tpu.dimension_semantics<parallel>, #tpu.dimension_semantics<parallel>], iteration_bounds = array<i64: 2, 1>, scalar_prefetch = 0 : i64, scratch_operands = 0 : i64, tpu.core_type = #tpu.core_type<tc>, window_params = [{pipeline_mode = #tpu.pipeline_mode<synchronous>, transform_indices = @transform_0, window_bounds = array<i64: 16, 16>}, {transform_indices = @transform_1, window_bounds = array<i64: 1, 16, 8>}, {transform_indices = @transform_2, window_bounds = array<i64: 1, 16, 8>}, {transform_indices = @transform_3, window_bounds = array<i64: 1, 16, 8>}]} {
    %c0 = arith.constant 0 : index
    %c0_0 = arith.constant 0 : index
    %0 = vector.load %arg2[%c0, %c0_0] : memref<16x16xf32, #tpu.memory_space<vmem>>, vector<16x16xf32>
    %c0_1 = arith.constant 0 : index
    %c0_2 = arith.constant 0 : index
    %c0_3 = arith.constant 0 : index
    %1 = vector.load %arg3[%c0_1, %c0_2, %c0_3] : memref<1x16x8xf32, #tpu.memory_space<vmem>>, vector<1x16x8xf32>
    %2 = vector.shape_cast %1 : vector<1x16x8xf32> to vector<16x8xf32>
    %cst = arith.constant dense<0.000000e+00> : vector<16x8xf32>
    %3 = tpu.matmul %0, %2, %cst {dimension_numbers = #tpu.dot_dimension_numbers<[1], [0], [0], [1], [0, 0, 1, 1], [], []>} : vector<16x16xf32>, vector<16x8xf32>, vector<16x8xf32> -> vector<16x8xf32>
    %c0_4 = arith.constant 0 : index
    %c0_5 = arith.constant 0 : index
    %c0_6 = arith.constant 0 : index
    %4 = vector.load %arg5[%c0_4, %c0_5, %c0_6] : memref<1x16x8xf32, #tpu.memory_space<vmem>>, vector<1x16x8xf32>
    %5 = vector.shape_cast %4 : vector<1x16x8xf32> to vector<16x8xf32>
    %6 = vector.shape_cast %3 : vector<16x8xf32> to vector<1x16x8xf32>
    tpu.vector_store %arg5[%c0_4, %c0_5, %c0_6], %6 {strides = array<i32>} : memref<1x16x8xf32, #tpu.memory_space<vmem>>, vector<1x16x8xf32>,
    %c0_7 = arith.constant 0 : index
    %c0_8 = arith.constant 0 : index
    %c0_9 = arith.constant 0 : index
    %7 = vector.load %arg3[%c0_7, %c0_8, %c0_9] : memref<1x16x8xf32, #tpu.memory_space<vmem>>, vector<1x16x8xf32>
    %8 = vector.shape_cast %7 : vector<1x16x8xf32> to vector<16x8xf32>
    %9 = arith.subf %8, %3 : vector<16x8xf32>
    %c0_10 = arith.constant 0 : index
    %c0_11 = arith.constant 0 : index
    %c0_12 = arith.constant 0 : index
    %10 = vector.load %arg4[%c0_10, %c0_11, %c0_12] : memref<1x16x8xf32, #tpu.memory_space<vmem>>, vector<1x16x8xf32>
    %11 = vector.shape_cast %10 : vector<1x16x8xf32> to vector<16x8xf32>
    %12 = vector.shape_cast %9 : vector<16x8xf32> to vector<1x16x8xf32>
    tpu.vector_store %arg4[%c0_10, %c0_11, %c0_12], %12 {strides = array<i32>} : memref<1x16x8xf32, #tpu.memory_space<vmem>>, vector<1x16x8xf32>,
    return
  }
  func.func @transform_0(%arg0: i32, %arg1: i32) -> (i32, i32) {
    %c0_i32 = arith.constant 0 : i32
    %c0_i32_0 = arith.constant 0 : i32
    %c0_i32_1 = arith.constant 0 : i32
    return %c0_i32, %c0_i32_0 : i32, i32
  }
  func.func @transform_1(%arg0: i32, %arg1: i32) -> (i32, i32, i32) {
    %c0_i32 = arith.constant 0 : i32
    %c0_i32_0 = arith.constant 0 : i32
    return %arg0, %c0_i32, %arg1 : i32, i32, i32
  }
  func.func @transform_2(%arg0: i32, %arg1: i32) -> (i32, i32, i32) {
    %c0_i32 = arith.constant 0 : i32
    %c0_i32_0 = arith.constant 0 : i32
    return %arg0, %c0_i32, %arg1 : i32, i32, i32
  }
  func.func @transform_3(%arg0: i32, %arg1: i32) -> (i32, i32, i32) {
    %c0_i32 = arith.constant 0 : i32
    %c0_i32_0 = arith.constant 0 : i32
    return %arg0, %c0_i32, %arg1 : i32, i32, i32
  }
}

</mosaic_0001>

<bundles_post_ra>
// kernel: tpu_custom_call.1
= control target key start
LH: loop header
LB: loop body
LE: loop exit
PB: predicated region body
PF: predicated region fallthrough
CT: control target
= control target key end

     0   :  { %s549_s12 = smov 0   ;;  %s551_s13 = smov 0   ;;  %s591_s0 = inlined_call_operand.vmem [shape: f32[16,16], index: 0, kind: input, shape index: {}]   ;;  %s592_s1 = inlined_call_operand.vmem [shape: f32[2,16,8], index: 1, kind: input, shape index: {}]   ;;  %s593_s2 = inlined_call_operand.vmem [shape: f32[2,16,8], index: 2, kind: output, shape index: {0}]   ;;  %s594_s3 = inlined_call_operand.vmem [shape: f32[2,16,8], index: 3, kind: output, shape index: {1}]  }
   0x1   :  { %s553_s14 = smov 0  }
   0x2 LB: > { %s26_s15 = sadd.s32 1, %s523_s13  ;;  %p452_p0 = scmp.ge.s32.totalorder %s527_s14, 1  ;;  %s527_s14 = sphi %s553_s14, %s14_s14   ;;  %s523_s13 = sphi %s551_s13, %s596_s13   ;;  %s519_s12 = sphi %s549_s12, %s595_s12  }
   0x3   : > { %p28_p1 = scmp.ge.s32.totalorder %s26_s15, 2  ;;  %p161_p2 = scmp.lt.s32.totalorder %s527_s14, 3 }
   0x5   : > { %s598_s15 = smov (%p28_p1, %s26_s15), 0  ;;  %p162_p3 = pnand %p452_p0, %p161_p2 }
   0x6   : > { %p199_p4 = scmp.lt.s32.totalorder (!%p162_p3), %s519_s12, 1  ;;  %v223_v0 = vld [vmem:[%s591_s0] sm:$0xff] (!%p162_p3)  ;;  %vm227_vm0 = vcmask (!%p162_p3), 130048   ;;  %v224_v4 = vld [vmem:[%s591_s0 + $0x8] sm:$0xff] (!%p162_p3)  ;;  %vm309_vm1 = vcmask (!%p162_p3), 64512  }
   0x7   : > { %165 = sbr.rel (%p162_p3) target bundleno = 240 (0xf0), region = 28  ;;  %474 = vmatprep.mubr.msk.f32.mxu0 (!%p162_p3), %vm227_vm0, %v223_v0 }
   0xe   : > { %s600_s12 = smov (!%p199_p4, %s519_s12), 1 }
   0xf   : > { %s463_s18 = sshll.u32 %s600_s12, 4 }
  0x10   : > { %s206_s21 = scalar_lea.vmem %s592_s1, %s463_s18  ;;  %s222_s26 = scalar_lea.vmem %s594_s3, %s463_s18 }
  0x11   : > { %v225_v1 = vld [vmem:[%s206_s21] sm:$0xff]  ;;  %v226_v2 = vld [vmem:[%s206_s21 + $0x8] sm:$0xff]  ;;  %s214_s29 = scalar_lea.vmem %s593_s2, %s463_s18 }
  0x12   : > { %v477_v3 = vpack.c.bf16 %v226_v2, %v225_v1 }
  0x14   : > { %478 = vmatprep.subr.bf16.mxu0 %v477_v3 }
  0x15   : > { %480 = vmatpush3.bf16.msra.mxu0 %v477_v3 }
  0x18   : > { %475 = vmatmul.mubr.msk.f32.vlgmr.msra.gmra.mrb[0].mxu0 %vm227_vm0, %v224_v4 }
  0xeb   : > { %v476_v5 = vpop.f32.mrb[0].mxu0 }
  0xec   : > { %311 = vst.msk [vmem:[%s222_s26 + $0x8] sm:$0xff] %vm309_vm1, %v476_v5  ;;  %v315_v6 = vsub.f32 %v226_v2, %v476_v5  ;;  %v300_v7 = vpop.f32.mrb[1].mxu0 }
  0xed   : > { %310 = vst.msk [vmem:[%s222_s26] sm:$0xff] %vm309_vm1, %v300_v7  ;;  %v314_v8 = vsub.f32 %v225_v1, %v300_v7 }
  0xee   : > { %317 = vst.msk [vmem:[%s214_s29 + $0x8] sm:$0xff] %vm309_vm1, %v315_v6 }
  0xef   : > { %316 = vst.msk [vmem:[%s214_s29] sm:$0xff] %vm309_vm1, %v314_v8 }
  0xf0 PF: > { %s14_s14 = sadd.s32 1, %s527_s14   ;;  %s595_s12 = smov %s523_s13 }
  0xf1   : > { %p11_p5 = scmp.ge.s32.totalorder %s14_s14, 4   ;;  %s596_s13 = smov %s598_s15 }
  0xf3   :  { %13 = sbr.rel (!%p11_p5) target bundleno = 2 (0x2), region = 70 }

</bundles_post_ra>
